<compile_context>
chip_gen: v7x
topology: tpu7x:2x2x1
jax: 0.10.0
libtpu: 0.0.40
codegen_flags: <defaults>
</compile_context>

<pallas_src>
import jax
import jax.numpy as jnp
from jax.experimental import pallas as pl
from jax.experimental.pallas import tpu as pltpu

_LANE = 128


def _round_up(x, m):
    return (x + m - 1) // m * m


def _cdiv(a, b):
    return -(-a // b)


def _vmem_budget():
    """Return (vmem_limit_bytes, usable budget for streamed blocks)."""
    cap = None
    try:
        cap = int(pltpu.get_tpu_info().vmem_capacity_bytes)
    except Exception:
        cap = None
    if not cap or cap <= 0:
        # Don't silently assume the smallest generation: v5e/v6e have 128 MiB.
        kind = ""
        try:
            kind = jax.devices()[0].device_kind.lower()
        except Exception:
            pass
        if any(t in kind for t in ("v5e", "v5 lite", "v5litepod", "v6e",
                                   "v6 lite", "trillium")):
            cap = 128 << 20
        else:
            cap = 64 << 20          # conservative: v7x per-TensorCore VMEM
    vmem_limit = min(cap * 3 // 4, 96 << 20)
    budget = max(vmem_limit - (4 << 20), 4 << 20)   # headroom for weights etc.
    return int(vmem_limit), int(budget)


def _num_tensorcores():
    """Best-effort TensorCore count (v7x has 2/chip); defaults to 1."""
    try:
        info = pltpu.get_tpu_info()
        for name in ("num_cores", "core_count", "num_tensorcores",
                     "cores_per_chip"):
            v = getattr(info, name, None)
            if isinstance(v, int) and v > 0:
                return v
    except Exception:
        pass
    return 1


# --------------------------------------------------------------------------
# One-pass kernel: the whole (1, C, HW) slab is resident for one grid step.
# --------------------------------------------------------------------------
def _make_onepass_kernel(inv_hw):
    def kernel(x_ref, w1_ref, w2_ref, o_ref):
        x = x_ref[...]                                            # (1, C, HW)
        # Squeeze: lane-reduce with f32 accumulation (no explicit f32 slab).
        pooled = jnp.sum(x, axis=-1, dtype=jnp.float32) * inv_hw  # (1, C)
        # Excitation: fc1 -> LeakyReLU(0.2) -> fc2 -> sigmoid (tiny, f32).
        h = jnp.dot(pooled, w1_ref[...], preferred_element_type=jnp.float32)
        h = jnp.where(h >= 0, h, 0.2 * h)
        s = jax.nn.sigmoid(
            jnp.dot(h, w2_ref[...], preferred_element_type=jnp.float32))  # (1, C)
        # Scale: broadcast the per-channel gate over the spatial lanes.
        o_ref[...] = x * s[:, :, None].astype(x.dtype)
    return kernel


# --------------------------------------------------------------------------
# Two-phase fallback kernels (pool+gate fused, then scale).
# --------------------------------------------------------------------------
def _make_pool_gate_kernel(inv_hw, hw_true, thw, need_mask):
    def kernel(x_ref, w1_ref, w2_ref, s_ref, acc_ref):
        t = pl.program_id(1)

        @pl.when(t == 0)
        def _():
            acc_ref[...] = jnp.zeros_like(acc_ref)

        x = x_ref[...]                                       # (1, C, thw)
        if need_mask:
            # Last tile may overhang HW; padded lanes are undefined -> zero.
            lane = jax.lax.broadcasted_iota(jnp.int32, x.shape, dimension=2)
            x = jnp.where(t * thw + lane < hw_true, x, 0)
        acc_ref[...] += jnp.sum(x, axis=-1, dtype=jnp.float32)   # (1, C)

        @pl.when(t == pl.num_programs(1) - 1)
        def _():
            # Fused excitation: tiny matmuls hidden under the last tile's DMA.
            pooled = acc_ref[...] * inv_hw                       # (1, C) f32
            h = jnp.dot(pooled, w1_ref[...],
                        preferred_element_type=jnp.float32)
            h = jnp.where(h >= 0, h, 0.2 * h)
            s = jax.nn.sigmoid(
                jnp.dot(h, w2_ref[...], preferred_element_type=jnp.float32))
            s_ref[...] = s[:, :, None]                           # (1, C, 1)
    return kernel


def _scale_kernel(x_ref, s_ref, o_ref):
    x = x_ref[...]                                 # (1, C, thw)
    o_ref[...] = x * s_ref[...].astype(x.dtype)    # s: (1, C, 1)


# --------------------------------------------------------------------------
# Wrapper.
# --------------------------------------------------------------------------
def se_block(x_nchw, fc1_weight, fc2_weight, *,
             force_two_phase=False, donate_x=False,
             max_tile_hw=None, split_hw_for_small_batch=None):
    """Squeeze-and-Excitation gating.

    x_nchw:     (B, C, H, W), any float dtype (streamed in native dtype).
    fc1_weight: (Cr, C)  -- PyTorch Linear layout (out, in), bias-free.
    fc2_weight: (C, Cr)  -- must map back to C channels.
    donate_x:   alias x's HBM buffer to the output (only set when x is not
                needed downstream; otherwise XLA inserts a defensive copy).
    """
    B, C, H, W = x_nchw.shape
    Cr, c_in = fc1_weight.shape
    c_out, cr_in = fc2_weight.shape
    assert c_in == C, f"fc1 expects {c_in} input channels, x has {C}"
    assert cr_in == Cr, "fc2 input dim must match fc1 output dim"
    assert c_out == C, "fc2 must produce exactly one gate per input channel"

    HW = H * W
    dtype = x_nchw.dtype
    dsize = jnp.dtype(dtype).itemsize
    inv_hw = 1.0 / float(HW)

    w1 = fc1_weight.T.astype(jnp.float32)     # (C, Cr)
    w2 = fc2_weight.T.astype(jnp.float32)     # (Cr, C)

    vmem_limit, budget = _vmem_budget()

    # Physical VMEM footprint of one (1, C, HW) block (lane/sublane padding,
    # sub-32-bit dtypes pack along sublanes).
    pack = max(1, 4 // dsize)
    c_pad = _round_up(C, 8 * pack)
    c_pad8 = _round_up(C, 8)
    hw_l = _round_up(HW, _LANE)
    slab_vmem = c_pad * hw_l * dsize
    # Possible materialized f32 upcast temp for the reduction (bf16: 2x block
    # bytes, fp8: 4x) -- counted explicitly instead of a fixed heuristic.
    temp_f32 = 0 if jnp.dtype(dtype) == jnp.dtype(jnp.float32) else c_pad8 * hw_l * 4

    fits_db = 4 * slab_vmem + temp_f32 <= budget          # in+out double-buffered
    fits_sb = 2 * slab_vmem + temp_f32 <= budget          # single-buffered
    one_pass = (not force_two_phase) and (fits_db or fits_sb)

    # v7x dual-TC small-batch case: grid=(B,) with B==1 leaves one core idle;
    # prefer the HW-tiled route (scale axis "parallel") so both cores stream.
    if split_hw_for_small_batch is None:
        split_hw_for_small_batch = (B == 1 and slab_vmem > (8 << 20)
                                    and _num_tensorcores() > 1)
    if split_hw_for_small_batch and not force_two_phase:
        one_pass = False

    x3 = x_nchw.reshape(B, C, HW)             # no padding, no trailing slice
    elem = B * C * HW
    bytes_x = elem * dsize
    gate_flops = 4 * B * C * Cr

    # ---------------- one-pass path: (C, HW) slab resident per batch --------
    if one_pass:
        single_buffer = not fits_db
        spec_kwargs = {"pipeline_mode": pl.Buffered(1)} if single_buffer else {}
        call_kwargs = {"input_output_aliases": {0: 0}} if donate_x else {}
        out = pl.pallas_call(
            _make_onepass_kernel(inv_hw),
            out_shape=jax.ShapeDtypeStruct((B, C, HW), dtype),
            grid=(B,),
            in_specs=[
                pl.BlockSpec((1, C, HW), lambda b: (b, 0, 0), **spec_kwargs),
                pl.BlockSpec((C, Cr), lambda b: (0, 0)),
                pl.BlockSpec((Cr, C), lambda b: (0, 0)),
            ],
            out_specs=pl.BlockSpec((1, C, HW), lambda b: (b, 0, 0),
                                   **spec_kwargs),
            compiler_params=pltpu.CompilerParams(
                dimension_semantics=("parallel",),
                vmem_limit_bytes=vmem_limit),
            cost_estimate=pl.CostEstimate(
                flops=int(3 * elem + gate_flops),
                transcendentals=int(B * C),
                bytes_accessed=int(2 * bytes_x)),
            **call_kwargs,
        )(x3, w1, w2)
        return out.reshape(B, C, H, W)

    # -------- two-phase fallback: tiled pool+gate -> tiled scale ------------
    hw128 = _round_up(HW, _LANE)

    def _derive_tile(stream_bufs, extra_f32_blocks):
        # Per-phase tile: size to the buffers that phase actually streams.
        per_lane = stream_bufs * c_pad * dsize + extra_f32_blocks * c_pad8 * 4
        cap = max(_LANE, (budget // max(per_lane, 1)) // _LANE * _LANE)
        if max_tile_hw is not None:
            cap = max(_LANE, min(cap, (max_tile_hw // _LANE) * _LANE))
        cap = min(cap, hw128)
        n_t = _cdiv(hw128, cap)
        thw = _round_up(_cdiv(hw128, n_t), _LANE)   # balanced, overshoot < 128*n_t
        return int(thw), int(n_t)

    # Pool pass streams only x (double-buffered) + a possible f32 upcast temp.
    thw_pool, ntp = _derive_tile(2, 0 if temp_f32 == 0 else 1)
    # Scale pass streams x in + out, both double-buffered, no upcast.
    thw_scale, nts = _derive_tile(4, 0)

    # Phase A: pooled channel means + fused gate, s = sigmoid(fc2(lrelu(fc1(.)))).
    s3 = pl.pallas_call(
        _make_pool_gate_kernel(inv_hw, HW, thw_pool, HW % thw_pool != 0),
        out_shape=jax.ShapeDtypeStruct((B, C, 1), jnp.float32),
        grid=(B, ntp),
        in_specs=[
            pl.BlockSpec((1, C, thw_pool), lambda b, t: (b, 0, t)),
            pl.BlockSpec((C, Cr), lambda b, t: (0, 0)),
            pl.BlockSpec((Cr, C), lambda b, t: (0, 0)),
        ],
        out_specs=pl.BlockSpec((1, C, 1), lambda b, t: (b, 0, 0)),
        scratch_shapes=[pltpu.VMEM((1, C), jnp.float32)],
        compiler_params=pltpu.CompilerParams(
            dimension_semantics=("parallel", "arbitrary"),
            vmem_limit_bytes=vmem_limit),
        cost_estimate=pl.CostEstimate(
            flops=int(elem + gate_flops),
            transcendentals=int(B * C),
            bytes_accessed=int(bytes_x)),
    )(x3, w1, w2)

    # Phase B: re-stream x and apply the per-channel gate (both axes parallel).
    scale_kwargs = {"input_output_aliases": {0: 0}} if donate_x else {}
    out = pl.pallas_call(
        _scale_kernel,
        out_shape=jax.ShapeDtypeStruct((B, C, HW), dtype),
        grid=(B, nts),
        in_specs=[
            pl.BlockSpec((1, C, thw_scale), lambda b, t: (b, 0, t)),
            pl.BlockSpec((1, C, 1), lambda b, t: (b, 0, 0)),
        ],
        out_specs=pl.BlockSpec((1, C, thw_scale), lambda b, t: (b, 0, t)),
        compiler_params=pltpu.CompilerParams(
            dimension_semantics=("parallel", "parallel"),
            vmem_limit_bytes=vmem_limit),
        cost_estimate=pl.CostEstimate(
            flops=int(elem), transcendentals=0,
            bytes_accessed=int(2 * bytes_x)),
        **scale_kwargs,
    )(x3, s3)

    return out.reshape(B, C, H, W)


def se_block_ref(x_nchw, fc1_weight, fc2_weight):
    """Pure-JAX reference matching the PyTorch forward."""
    xf = x_nchw.astype(jnp.float32)
    pooled = jnp.mean(xf, axis=(2, 3))                    # (B, C)
    h = pooled @ fc1_weight.astype(jnp.float32).T
    h = jnp.where(h >= 0, h, 0.2 * h)
    s = jax.nn.sigmoid(h @ fc2_weight.astype(jnp.float32).T)
    return (xf * s[:, :, None, None]).astype(x_nchw.dtype)


if __name__ == "__main__":
    key = jax.random.PRNGKey(0)
    k_x, k_w1, k_w2, k_x2 = jax.random.split(key, 4)

    B, C, H, W = 2, 4, 16, 16
    reduction = 1
    Cr = C // reduction

    x = jax.random.normal(k_x, (B, C, H, W), dtype=jnp.float32)
    # PyTorch Linear weight layout: (out, in), both layers bias-free.
    fc1_w = 0.1 * jax.random.normal(k_w1, (Cr, C), dtype=jnp.float32)
    fc2_w = 0.1 * jax.random.normal(k_w2, (C, Cr), dtype=jnp.float32)

    y_ref = se_block_ref(x, fc1_w, fc2_w)

    # Fast path: one pass per batch (slab resident in VMEM, batch axis parallel).
    y1 = se_block(x, fc1_w, fc2_w)
    jax.block_until_ready(y1)
    assert jnp.allclose(y1, y_ref, atol=1e-5, rtol=1e-5), "one-pass mismatch"

    # Fallback path: HW-tiled pool+gate kernel + separate scale pass
    # (forced here with a small tile so the reduction grid axis is exercised).
    y2 = se_block(x, fc1_w, fc2_w, force_two_phase=True, max_tile_hw=128)
    jax.block_until_ready(y2)
    assert jnp.allclose(y2, y_ref, atol=1e-5, rtol=1e-5), "two-phase mismatch"

    # Non-128-multiple spatial size: no wrapper pad/slice on either path
    # (one-pass uses full-HW blocks; two-phase masks the partial last tile).
    H2, W2 = 10, 10
    x_odd = jax.random.normal(k_x2, (B, C, H2, W2), dtype=jnp.float32)
    y_ref_odd = se_block_ref(x_odd, fc1_w, fc2_w)
    y3 = se_block(x_odd, fc1_w, fc2_w)
    jax.block_until_ready(y3)
    assert jnp.allclose(y3, y_ref_odd, atol=1e-5, rtol=1e-5), "odd one-pass mismatch"
    y4 = se_block(x_odd, fc1_w, fc2_w, force_two_phase=True, max_tile_hw=128)
    jax.block_until_ready(y4)
    assert jnp.allclose(y4, y_ref_odd, atol=1e-5, rtol=1e-5), "odd two-phase mismatch"

    # bf16 streaming + input/output aliasing (gate applied in storage dtype,
    # so compare with a loose tolerance vs. the f32-multiply reference).
    xb = x.astype(jnp.bfloat16)
    yb = se_block(xb, fc1_w, fc2_w, donate_x=True)
    jax.block_until_ready(yb)
    yb_ref = se_block_ref(xb, fc1_w, fc2_w)
    assert jnp.allclose(yb.astype(jnp.float32), yb_ref.astype(jnp.float32),
                        atol=5e-2, rtol=5e-2), "bf16 mismatch"

    print("KERNEL_OK")
</pallas_src>

<mosaic_0001>
module attributes {stable_mosaic.version = 11 : i64} {
  func.func @kernel(%arg0: i32, %arg1: memref<1x4x256xf32, #tpu.memory_space<vmem>>, %arg2: memref<4x4xf32, #tpu.memory_space<vmem>>, %arg3: memref<4x4xf32, #tpu.memory_space<vmem>>, %arg4: memref<1x4x256xf32, #tpu.memory_space<vmem>>) attributes {dimension_semantics = [#tpu.dimension_semantics<parallel>], iteration_bounds = array<i64: 2>, scalar_prefetch = 0 : i64, scratch_operands = 0 : i64, tpu.core_type = #tpu.core_type<tc>, window_params = [{transform_indices = @transform_0, window_bounds = array<i64: 1, 4, 256>}, {pipeline_mode = #tpu.pipeline_mode<synchronous>, transform_indices = @transform_1, window_bounds = array<i64: 4, 4>}, {pipeline_mode = #tpu.pipeline_mode<synchronous>, transform_indices = @transform_2, window_bounds = array<i64: 4, 4>}, {transform_indices = @transform_3, window_bounds = array<i64: 1, 4, 256>}]} {
    %c0 = arith.constant 0 : index
    %c0_0 = arith.constant 0 : index
    %c0_1 = arith.constant 0 : index
    %0 = vector.load %arg1[%c0, %c0_0, %c0_1] : memref<1x4x256xf32, #tpu.memory_space<vmem>>, vector<1x4x256xf32>
    %cst = arith.constant dense<0.000000e+00> : vector<1x4xf32>
    %1 = vector.multi_reduction <add>, %0, %cst [2] : vector<1x4x256xf32> to vector<1x4xf32>
    %cst_2 = arith.constant 3.906250e-03 : f32
    %2 = vector.broadcast %cst_2 : f32 to vector<1x4xf32>
    %3 = arith.mulf %1, %2 : vector<1x4xf32>
    %c0_3 = arith.constant 0 : index
    %c0_4 = arith.constant 0 : index
    %4 = vector.load %arg2[%c0_3, %c0_4] : memref<4x4xf32, #tpu.memory_space<vmem>>, vector<4x4xf32>
    %cst_5 = arith.constant dense<0.000000e+00> : vector<1x4xf32>
    %5 = tpu.matmul %3, %4, %cst_5 {dimension_numbers = #tpu.dot_dimension_numbers<[1], [0], [0], [1], [0, 0, 1, 1], [], []>} : vector<1x4xf32>, vector<4x4xf32>, vector<1x4xf32> -> vector<1x4xf32>
    %cst_6 = arith.constant 0.000000e+00 : f32
    %6 = vector.broadcast %cst_6 : f32 to vector<1x4xf32>
    %7 = arith.cmpf oge, %5, %6 : vector<1x4xf32>
    %cst_7 = arith.constant 2.000000e-01 : f32
    %8 = vector.broadcast %cst_7 : f32 to vector<1x4xf32>
    %9 = arith.mulf %8, %5 : vector<1x4xf32>
    %10 = arith.select %7, %5, %9 : vector<1x4xi1>, vector<1x4xf32>
    %c0_8 = arith.constant 0 : index
    %c0_9 = arith.constant 0 : index
    %11 = vector.load %arg3[%c0_8, %c0_9] : memref<4x4xf32, #tpu.memory_space<vmem>>, vector<4x4xf32>
    %cst_10 = arith.constant dense<0.000000e+00> : vector<1x4xf32>
    %12 = tpu.matmul %10, %11, %cst_10 {dimension_numbers = #tpu.dot_dimension_numbers<[1], [0], [0], [1], [0, 0, 1, 1], [], []>} : vector<1x4xf32>, vector<4x4xf32>, vector<1x4xf32> -> vector<1x4xf32>
    %13 = arith.negf %12 : vector<1x4xf32>
    %14 = math.exp %13 : vector<1x4xf32>
    %cst_11 = arith.constant 1.000000e+00 : f32
    %15 = vector.broadcast %cst_11 : f32 to vector<1x4xf32>
    %16 = arith.addf %15, %14 : vector<1x4xf32>
    %17 = arith.divf %15, %16 : vector<1x4xf32>
    %18 = vector.shape_cast %17 : vector<1x4xf32> to vector<1x4x1xf32>
    %19 = vector.broadcast %18 : vector<1x4x1xf32> to vector<1x4x256xf32>
    %20 = arith.mulf %0, %19 : vector<1x4x256xf32>
    %c0_12 = arith.constant 0 : index
    %c0_13 = arith.constant 0 : index
    %c0_14 = arith.constant 0 : index
    %21 = vector.load %arg4[%c0_12, %c0_13, %c0_14] : memref<1x4x256xf32, #tpu.memory_space<vmem>>, vector<1x4x256xf32>
    tpu.vector_store %arg4[%c0_12, %c0_13, %c0_14], %20 {strides = array<i32>} : memref<1x4x256xf32, #tpu.memory_space<vmem>>, vector<1x4x256xf32>,
    return
  }
  func.func @transform_0(%arg0: i32) -> (i32, i32, i32) {
    %c0_i32 = arith.constant 0 : i32
    %c0_i32_0 = arith.constant 0 : i32
    %c0_i32_1 = arith.constant 0 : i32
    return %arg0, %c0_i32, %c0_i32_0 : i32, i32, i32
  }
  func.func @transform_1(%arg0: i32) -> (i32, i32) {
    %c0_i32 = arith.constant 0 : i32
    %c0_i32_0 = arith.constant 0 : i32
    %c0_i32_1 = arith.constant 0 : i32
    return %c0_i32, %c0_i32_0 : i32, i32
  }
  func.func @transform_2(%arg0: i32) -> (i32, i32) {
    %c0_i32 = arith.constant 0 : i32
    %c0_i32_0 = arith.constant 0 : i32
    %c0_i32_1 = arith.constant 0 : i32
    return %c0_i32, %c0_i32_0 : i32, i32
  }
  func.func @transform_3(%arg0: i32) -> (i32, i32, i32) {
    %c0_i32 = arith.constant 0 : i32
    %c0_i32_0 = arith.constant 0 : i32
    %c0_i32_1 = arith.constant 0 : i32
    return %arg0, %c0_i32, %c0_i32_0 : i32, i32, i32
  }
}

</mosaic_0001>

<bundles_post_ra>
// kernel: tpu_custom_call.1
= control target key start
LH: loop header
LB: loop body
LE: loop exit
PB: predicated region body
PF: predicated region fallthrough
CT: control target
= control target key end

     0   :  { %8 = vsyncpa [#allocation3], 0  ;;  %s964_s0 = inlined_call_operand.hbm [shape: f32[2,4,256], index: 0, kind: input, shape index: {}]   ;;  %s965_s1 = inlined_call_operand.hbm [shape: f32[4,4], index: 1, kind: input, shape index: {}]   ;;  %s966_s2 = inlined_call_operand.vmem [shape: f32[4,4], index: 2, kind: input, shape index: {}]   ;;  %s967_s3 = inlined_call_operand.hbm [shape: f32[2,4,256], index: 3, kind: output, shape index: {}]  }
   0x1   :  { %10 = vsyncpa [#allocation3 + $0x1], 0 }
   0x2   :  { %11 = vsyncpa [#allocation6], 0 }
   0x3   :  { %12 = vsyncpa [#allocation4], 0 }
   0x4   :  { %14 = vsyncpa [#allocation4 + $0x1], 0  ;;  %s752_s12 = smov 0   ;;  %s754_s13 = smov 0  }
   0x5   :  { %s756_s14 = smov 0   ;;  %s758_s15 = smov 0  }
   0x6 LB: > { %s773_s16 = sadd.s32 4294967295, %s724_s15   ;;  %s494_s17 = sadd.s32 4294967294, %s724_s15   ;;  %s724_s15 = sphi %s758_s15, %s991_s15   ;;  %s720_s14 = sphi %s756_s14, %s990_s14   ;;  %s716_s13 = sphi %s754_s13, %s989_s13   ;;  %s712_s12 = sphi %s752_s12, %s988_s12  }
   0x7   : > { %p40_p0 = scmp.ne.s32.totalorder %s716_s13, %s712_s12  ;;  %p968_p1 = scmp.eq.s32.totalorder %s773_s16, 0 }
   0x8   : > { %p112_p3 = scmp.eq.s32.totalorder %s494_s17, 1  ;;  %p495_p5 = scmp.ge.s32.totalorder %s724_s15, 1 }
   0x9   : > { %p782_p4 = por %p968_p1, %p40_p0  ;;  %p119_p7 = scmp.lt.s32.totalorder %s724_s15, 3 }
   0xa   : > { %p787_p6 = por %p112_p3, %p40_p0  ;;  %s726_s21 = smov [#allocation5]  }
   0xb   : > { %s971_s18 = scalar_select %p782_p4, 1, 0 }
   0xc   : > { %s972_s19 = scalar_select %p787_p6, 1, 0 }
   0xd   : > { %p792_p8 = pnand %p495_p5, %p119_p7  ;;  %s132_s22 = sshll.u32 %s726_s21, 4  ;;  %s133_s22 = int_to_ptr.vmem [resolvable:$true] %s132_s22 }
   0xe   : > { %s800_s23 = sadd.s32 1, %s724_s15   ;;  %s27_s27 = sadd.s32 1, %s720_s14 }
   0xf   : > { %s973_s20 = scalar_select %p792_p8, 1, 0 }
  0x10   : > { %p539_p10 = pneg %p792_p8  ;;  %s24_s25 = ssub.s32 %s724_s15, %s800_s23 }
  0x11   : > { %p810_p12 = scmp.eq.s32.totalorder %s24_s25, 0  ;;  %s596_s30 = scalar_lea.hbm %s965_s1, 64 }
  0x12   : > { %p804_p11 = pnand %p539_p10, %p968_p1  ;;  %p597_p0 = scmp.ne.s32.totalorder %s965_s1, %s596_s30 }
  0x13   : > { %s975_s26 = scalar_select %p810_p12, 1, 0 }
  0x14   : > { %p598_p3 = pneg %p804_p11  ;;  %p603_p10 = scmp.lt.u32.totalorder %s596_s30, %s965_s1 }
  0x16   : > { %p599_p5 = pnand %p598_p3, %p597_p0 }
  0x18   : > { %p600_p7 = pneg %p599_p5 }
  0x1a   : > { %p605_p9 = pnand %p603_p10, %p600_p7 }
  0x1c   : > { %608 = shalt.err (!%p605_p9)
}
  0x1d   : > { %s609_s8 = scalar_lea.vmem %s133_s22, 64  ;;  %p617_p6 = scmp.lt.s32.totalorder %s133_s22, %s133_s22 }
  0x1e   : > { %p610_p1 = scmp.ne.s32.totalorder %s133_s22, %s609_s8  ;;  %p618_p4 = scmp.lt.s32.totalorder %s609_s8, %s609_s8 }
  0x20   : > { %p612_p2 = pnand %p610_p1, %p598_p3  ;;  %p619_p8 = por %p618_p4, %p617_p6 }
  0x22   : > { %p613_p13 = pneg %p612_p2 }
  0x24   : > { %p620_p12 = pnand %p619_p8, %p613_p13 }
  0x26   : > { %623 = shalt.err (!%p620_p12)
}
  0x27   : > { %542 = dma.hbm_to_vmem [thread:$0]  (!%p804_p11), %s965_s1, 64, %s133_s22, [#allocation6]  }
  0x28   : > { %p976_p1 = scmp.ne.s32.totalorder %s975_s26, 0  ;;  %p35_p2 = scmp.eq.s32.totalorder %s724_s15, 0 }
  0x29   : > { %p977_p4 = scmp.ne.s32.totalorder %s720_s14, %s716_s13  ;;  %p978_p6 = scmp.eq.s32.totalorder %s773_s16, 1 }
  0x2a   : > { %s836_s11 = scalar_select %p976_p1, %s720_s14, %s27_s27  }
  0x2b   : > { %p844_p8 = por %p978_p6, %p977_p4  ;;  %p552_p9 = scmp.lt.s32.totalorder %s724_s15, 2 }
  0x2c   : > { %s146_s21 = sand.u32 1, %s720_s14   ;;  %p980_p12 = pmov %p977_p4 }
  0x2d   : > { %s498_s24 = sshll.u32 %s146_s21, 3  ;;  %s515_s25 = sshll.u32 %s724_s15, 7 }
  0x2e   : > { %p36_p13 = por %p35_p2, %p980_p12  ;;  %s857_s22 = scalar_lea.hbm %s964_s0, %s515_s25 }
  0x2f   : > { %s150_s26 = scalar_lea.vmem [#allocation2], %s498_s24  ;;  %s147_s4 = scalar_lea.sflag [#allocation3], %s146_s21 }
  0x30   : > { %s158_s27 = sshll.u32 %s150_s26, 4  ;;  %p859_p11 = pnand %p552_p9, %p36_p13  ;;  %s863_s27 = int_to_ptr.vmem [resolvable:$true] %s158_s27 }
  0x31   : > { %s624_s5 = scalar_lea.hbm %s857_s22, 128  ;;  %s629_s8 = scalar_lea.hbm %s964_s0, 256 }
  0x32   : > { %p625_p0 = scmp.ne.s32.totalorder %s857_s22, %s624_s5  ;;  %p626_p3 = pneg %p859_p11 }
  0x33   : > { %p630_p10 = scmp.lt.u32.totalorder %s857_s22, %s964_s0  ;;  %p631_p1 = scmp.lt.u32.totalorder %s629_s8, %s624_s5 }
  0x34   : > { %p627_p5 = pnand %p626_p3, %p625_p0  ;;  %p633_p4 = scmp.lt.u32.totalorder %s624_s5, %s857_s22 }
  0x35   : > { %p632_p2 = por %p631_p1, %p630_p10 }
  0x36   : > { %p628_p7 = pneg %p627_p5 }
  0x37   : > { %p634_p6 = por %p633_p4, %p632_p2 }
  0x39   : > { %p635_p9 = pnand %p634_p6, %p628_p7 }
  0x3b   : > { %638 = shalt.err (!%p635_p9)
}
  0x3c   : > { %s639_s21 = scalar_lea.vmem %s863_s27, 128  ;;  %s727_s24 = smov [#allocation2]  }
  0x3d   : > { %p640_p12 = scmp.ne.s32.totalorder %s863_s27, %s639_s21  ;;  %s644_s25 = sshll.u32 %s727_s24, 4  ;;  %s645_s25 = int_to_ptr.vmem [resolvable:$false] %s644_s25 }
  0x3e   : > { %s646_s28 = scalar_lea.vmem %s645_s25, 256  ;;  %p647_p5 = scmp.lt.s32.totalorder %s863_s27, %s645_s25 }
  0x3f   : > { %p642_p13 = pnand %p640_p12, %p626_p3  ;;  %p648_p10 = scmp.lt.s32.totalorder %s646_s28, %s639_s21 }
  0x41   : > { %p643_p0 = pneg %p642_p13  ;;  %p649_p1 = por %p648_p10, %p647_p5 }
  0x43   : > { %p650_p2 = pnand %p649_p1, %p643_p0 }
  0x45   : > { %653 = shalt.err (!%p650_p2)
}
  0x46   : > { %546 = dma.hbm_to_vmem [thread:$0]  (!%p859_p11), %s857_s22, 128, %s863_s27, %s147_s4  }
  0x47   : > { %p982_p7 = scmp.ne.s32.totalorder %s973_s20, 0 }
  0x48   : > { %s893_s29 = sand.u32 (!%p982_p7), 1, %s716_s13   ;;  %p983_p3 = scmp.ne.s32.totalorder (!%p982_p7), %s971_s18, 0 }
  0x49   : > { %167 = sbr.rel (%p982_p7) target bundleno = 824 (0x338), region = 32  ;;  %s502_s26 = sshll.u32 (!%p982_p7), %s893_s29, 3 }
  0x4a   : > { %s170_s5 = scalar_lea.sflag (!%p982_p7), [#allocation3], %s893_s29  ;;  %s173_s6 = scalar_lea.vmem (!%p982_p7), [#allocation2], %s502_s26 }
  0x50   : > { %699 = dma.done.wait (%p983_p3), %s170_s5, 128  }
  0x51   : > { %701 = vsyncadd (%p983_p3), %s170_s5, 4294967168  ;;  %p984_p11 = scmp.eq.s32.totalorder %s773_s16, 0 }
  0x53   : > { %703 = dma.done.wait (%p984_p11), [#allocation6], 64   ;;  %p985_p4 = pmov %p984_p11 }
  0x54   : > { %vm204_vm0 = vcmask 1043456   ;;  %v200_v0 = vld [vmem:[%s173_s6] sm:$0xff]  ;;  %v728_v5 = vmov 0.0   ;;  %v211_v6 = vld [vmem:[#allocation5] sm:$0xf]  ;;  %vm729_vm1 = vmmov 0   ;;  %v213_v7 = vlaneseq }
  0x55   : > { %705 = vsyncadd (%p985_p4), [#allocation6], 4294967232  ;;  %v202_v1 = vcombine.high %v200_v0, %v200_v0  ;;  %v205_v2 = vsel %vm204_vm0, %v200_v0, 0.0  ;;  %521 = vmatprep.subr.mxu0 %v728_v5  ;;  %526 = vmatprep.subr.mxu1 %v728_v5  ;;  %vm219_vm2 = vcmask 31744   ;;  %v298_v14 = vld [vmem:[%s966_s2] sm:$0xf] }
  0x56   : > { %522 = vmatpush3.msk.msra.mxu0 %vm204_vm0, %v211_v6  ;;  %523 = vmatprep.mubr.msk.f32.mxu0 %vm729_vm1, %v728_v5  ;;  %v214_v8 = vand.u32 127, %v213_v7  ;;  %v216_v9 = vshrl.u32 %v213_v7, 7  ;;  %v730_v27 = vmov 839922192   ;;  %s516_s22 = sshll.u32 %s773_s16, 7  ;;  %s199_s27 = scalar_lea.vmem [#allocation7], %s502_s26 }
  0x57   : > { %v206_v3 = vsel %vm204_vm0, %v202_v1, 0.0  ;;  %528 = vmatprep.mubr.msk.f32.mxu1 %vm729_vm1, %v728_v5  ;;  %527 = vmatpush3.msk.msra.mxu1 %vm204_vm0, %v298_v14  ;;  %v390_v28 = vunpack.c.l.s4 %v730_v27  ;;  %s414_s30 = sshll.u32 %s199_s27, 4  ;;  %s920_s8 = scalar_lea.hbm %s967_s3, %s516_s22  ;;  %s922_s30 = int_to_ptr.vmem [resolvable:$true] %s414_s30 }
  0x58   : > { %v207_v4 = vadd.f32 %v206_v3, %v205_v2  ;;  %v217_v10 = vsub.s32 %v214_v8, %v216_v9  ;;  %v383_v24 = vsub.s32 0, %v216_v9  ;;  %s400_s9 = scalar_lea.sflag [#allocation4], %s893_s29  ;;  %s654_s10 = scalar_lea.vmem %s922_s30, 128 }
  0x59   : > { %v391_v29 = vunpack.c.0.s8 %v390_v28  ;;  %p655_p6 = scmp.ne.s32.totalorder %s922_s30, %s654_s10  ;;  %s731_s16 = smov [#allocation7]  }
  0x5a   : > { %208 = vadd.xlane.f32.xlu0 %v207_v4  ;;  %s658_s21 = sshll.u32 %s731_s16, 4  ;;  %s659_s21 = int_to_ptr.vmem [resolvable:$false] %s658_s21 }
  0x5b   : > { %v394_v30 = vsub.s32 %v391_v29, %v216_v9  ;;  %p656_p9 = pnand %p655_p6, %p844_p8  ;;  %s660_s24 = scalar_lea.vmem %s659_s21, 256 }
  0x5c   : > { %p661_p13 = scmp.lt.s32.totalorder %s922_s30, %s659_s21  ;;  %p662_p0 = scmp.lt.s32.totalorder %s660_s24, %s654_s10 }
  0x5d   : > { %p657_p12 = pneg %p656_p9 }
  0x5e   : > { %p663_p5 = por %p662_p0, %p661_p13 }
  0x60   : > { %p664_p10 = pnand %p663_p5, %p657_p12 }
  0xe7   : > { %v209_v11 = vpop.xlane.xlu0 %208 }
  0xe8   : > { %v210_v12 = vmul.f32 0.00390625, %v209_v11 }
  0xea   : > { %v218_v13 = vrot.slane %v210_v12, %v217_v10 }
  0xec   : > { %524 = vmatmul.mubr.msk.f32.vlgmr.msra.gmra.mrb[0].mxu0 %vm219_vm2, %v218_v13 }
 0x1bf   : > { %v291_v15 = vpop.f32.mrb[0].mxu0 }
 0x1c0   : > { %vm295_vm3 = vcmp.ge.f32.partialorder %v291_v15, 0.0  ;;  %v296_v16 = vmul.f32 0.2, %v291_v15  ;;  %v525_v17 = vpop.f32.mrb[1].mxu0 }
 0x1c2   : > { %v297_v18 = vsel %vm295_vm3, %v291_v15, %v296_v16 }
 0x1c3   : > { %529 = vmatmul.mubr.msk.f32.vlgmr.msra.gmra.mrb[0].mxu1 %vm219_vm2, %v297_v18 }
 0x296   : > { %v371_v19 = vpop.f32.mrb[0].mxu1 }
 0x297   : > { %v509_v20 = vmul.f32 -1.442695, %v371_v19  ;;  %v530_v21 = vpop.f32.mrb[1].mxu1 }
 0x299   : > { %592 = vpow2.f32 %v509_v20 }
 0x2a3   : > { %v593_v22 = vpop.eup %592 }
 0x2a4   : > { %v378_v23 = vadd.f32 1.0, %v593_v22 }
 0x2a6   : > { %594 = vrcp.f32 %v378_v23 }
 0x2b0   : > { %v595_v25 = vpop.eup %594 }
 0x2b1   : > { %v384_v26 = vrot.slane %v595_v25, %v383_v24 }
 0x2b3   : > { %386 = vbcast.lane.b32.xlu0 %v384_v26, 256 }
 0x325   : > { %v387_v31 = vpop.permute.xlu0 %386 }
 0x326   : > { %v395_v32 = vrot.slane %v387_v31, %v394_v30 }
 0x328   : > { %v397_v33 = vmul.f32 %v395_v32, %v200_v0 }
 0x32a   : > { %398 = vst [vmem:[%s199_s27] sm:$0xff] %v397_v33 }
 0x32b   : > { %667 = shalt.err (!%p664_p10)
}
 0x32c   : > { %s668_s25 = scalar_lea.hbm %s920_s8, 128  ;;  %s672_s26 = scalar_lea.hbm %s967_s3, 256 }
 0x32d   : > { %p669_p1 = scmp.ne.s32.totalorder %s920_s8, %s668_s25  ;;  %p673_p3 = scmp.lt.u32.totalorder %s920_s8, %s967_s3 }
 0x32e   : > { %p674_p11 = scmp.lt.u32.totalorder %s672_s26, %s668_s25  ;;  %p676_p6 = scmp.lt.u32.totalorder %s668_s25, %s920_s8 }
 0x32f   : > { %p670_p2 = pnand %p669_p1, %p844_p8 }
 0x330   : > { %p675_p4 = por %p674_p11, %p673_p3 }
 0x331   : > { %p671_p7 = pneg %p670_p2 }
 0x332   : > { %p677_p9 = por %p676_p6, %p675_p4 }
 0x334   : > { %p678_p12 = pnand %p677_p9, %p671_p7 }
 0x336   : > { %681 = shalt.err (!%p678_p12)
}
 0x337   : > { %537 = dma.vmem_to_hbm [thread:$0]  (%p844_p8), %s922_s30, 128, %s920_s8, %s400_s9  }
 0x338 PF: > { %s426_s18 = sand.u32 1, %s712_s12   ;;  %p986_p13 = scmp.ne.s32.totalorder %s972_s19, 0 }
 0x339   : > { %p987_p0 = scmp.ge.s32.totalorder %s724_s15, 2  ;;  %s427_s20 = scalar_lea.sflag [#allocation4], %s426_s18 }
 0x33b   : > { %p548_p5 = pnand %p987_p0, %p986_p13 }
 0x33d   : > { %707 = dma.done.wait (!%p548_p5), %s427_s20, 128  }
 0x33e   : > { %709 = vsyncadd (!%p548_p5), %s427_s20, 4294967168  ;;  %p17_p10 = scmp.ge.s32.totalorder %s800_s23, 4   ;;  %s988_s12 = smov %s716_s13 }
 0x33f   : > { %s989_s13 = smov %s720_s14  ;;  %s990_s14 = smov %s836_s11 }
 0x340   : > { %s991_s15 = smov %s800_s23  ;;  %19 = sbr.rel (!%p17_p10) target bundleno = 6 (0x6), region = 81 }
 0x347   :  { %432 = vsyncpa [#allocation3], 1 }
 0x348   :  { %434 = vsyncpa [#allocation3 + $0x1], 1 }
 0x349   :  { %435 = vsyncpa [#allocation6], 1 }
 0x34a   :  { %436 = vsyncpa [#allocation4], 1 }
 0x34b   :  { %438 = vsyncpa [#allocation4 + $0x1], 1 }

</bundles_post_ra>
